<compile_context>
chip_gen: v7x
topology: tpu7x:2x2x1
jax: 0.10.0
libtpu: 0.0.40
codegen_flags: <defaults>
</compile_context>

<pallas_src>
import functools

import jax
import jax.numpy as jnp
from jax.experimental import pallas as pl
from jax.experimental.pallas import tpu as pltpu


# ---------------------------------------------------------------------------
# padding / tiling helpers
# ---------------------------------------------------------------------------
def _round_up(x, m):
    return ((x + m - 1) // m) * m


def _pad2d(a, rows, cols):
    r, c = a.shape
    if r == rows and c == cols:
        return a
    return jnp.pad(a, ((0, rows - r), (0, cols - c)))


def _divisor_tile(dim, base, cap):
    """Largest multiple of `base` dividing `dim` that is <= cap (None if none)."""
    best = None
    t = base
    limit = min(dim, cap)
    while t <= limit:
        if dim % t == 0:
            best = t
        t += base
    return best


def _static_pow(x, p):
    """x**p with small integer p strength-reduced to VALU multiplies."""
    pf = float(p)
    if pf.is_integer() and 0.0 <= pf <= 16.0:
        n = int(pf)
        if n == 0:
            return jnp.ones_like(x)
        result = None
        base = x
        while n:
            if n & 1:
                result = base if result is None else result * base
            n >>= 1
            if n:
                base = base * base
        return result
    return jnp.power(x, pf)


def _choose_tiles(Mp, Kp, Fp, Cp, *, tm_cap=256, tk_cap=2048,
                  vmem_budget=24 * 1024 * 1024):
    """Pick (tm, tk): prefer 256-aligned contraction tiles (v6e/v7x MXU),
    16-aligned batch tiles (bf16 sublane packing), and keep the double-buffered
    footprint within a conservative VMEM budget (v7x has only 64 MiB)."""
    def est(tm, tk):
        return (2 * tm * tk * 2        # x tiles (bf16, double-buffered)
                + 2 * tk * Fp * 2      # w1 tiles (bf16, double-buffered)
                + 2 * Fp * Cp * 2      # resident w2 (bf16)
                + 2 * tm * Cp * 4      # targets tiles (f32)
                + tm * Fp * 4          # f32 accumulator scratch
                + 2 * tm * Fp * 4      # features output tiles
                + 2 * tm * Cp * 4      # logits output tiles
                + 2 * tm * 128 * 4)    # loss-partial output tiles

    tm = _divisor_tile(Mp, 16, tm_cap)
    tk = _divisor_tile(Kp, 256, tk_cap) or _divisor_tile(Kp, 128, tk_cap)
    # Shrink the contraction tile first, then the batch tile, if over budget.
    while (est(tm, tk) > vmem_budget and tk >= 512
           and (tk // 2) % 128 == 0 and Kp % (tk // 2) == 0):
        tk //= 2
    while (est(tm, tk) > vmem_budget and tm >= 32
           and (tm // 2) % 16 == 0 and Mp % (tm // 2) == 0):
        tm //= 2
    return tm, tk, est(tm, tk)


# ---------------------------------------------------------------------------
# Fused kernel: linear1 (tiled, f32 acc) -> +b1 -> linear2 (resident w2,b2)
#               -> masked MultiLabelLoss per-row partial sums
# ---------------------------------------------------------------------------
def _graft_fused_kernel(x_ref, w1_ref, b1_ref, w2_ref, b2_ref,
                        t_ref, cw_ref, cmask_ref, rmask_ref,
                        feat_ref, logits_ref, lpart_ref, acc_ref, *,
                        gamma, beta, wbce_w, fl_w, asl_w, compute_loss):
    k = pl.program_id(1)

    @pl.when(k == 0)
    def _():
        acc_ref[...] = jnp.zeros_like(acc_ref)

    # First linear: bf16 MXU inputs, f32 accumulation.
    acc_ref[...] += jnp.dot(x_ref[...], w1_ref[...],
                            preferred_element_type=jnp.float32)

    @pl.when(k == pl.num_programs(1) - 1)
    def _():
        # ---- epilogue: bias, classifier head, loss partials (once per M tile)
        feat = acc_ref[...] + b1_ref[...]                       # (tm, Fp) f32
        feat_ref[...] = feat.astype(feat_ref.dtype)

        logits = jnp.dot(feat.astype(jnp.bfloat16), w2_ref[...],
                         preferred_element_type=jnp.float32) + b2_ref[...]
        logits_ref[...] = logits.astype(logits_ref.dtype)

        if compute_loss:
            t = t_ref[...]                                      # (tm, Cp)
            cw = cw_ref[...]                                    # (1, Cp)
            mask = rmask_ref[...] * cmask_ref[...]              # (tm, Cp) valid mask

            # Stable BCE-with-logits; the same exp(-|x|) feeds the sigmoid
            # (a single EUP exp per element).
            e = jnp.exp(-jnp.abs(logits))
            bce = jnp.maximum(logits, 0.0) - logits * t + jnp.log1p(e)
            inv = 1.0 / (1.0 + e)
            probs = jnp.where(logits >= 0.0, inv, e * inv)      # == sigmoid(logits)

            pt = t * probs + (1.0 - t) * (1.0 - probs)
            fl_mod = _static_pow(1.0 - pt, gamma)               # (1-pt)^gamma, VALU
            asl_mod = _static_pow(probs, beta)                  # p^beta,       VALU

            # wbce_w*bce*cw + fl_w*bce*fl_mod + asl_w*(t*bce + (1-t)*bce*asl_mod)
            weight = (wbce_w * cw + fl_w * fl_mod
                      + asl_w * (t + (1.0 - t) * asl_mod))
            elem = bce * weight * mask
            row_sum = jnp.sum(elem, axis=-1, keepdims=True)     # (tm, 1)
            lpart_ref[...] = jnp.broadcast_to(row_sum, lpart_ref.shape)
        else:
            lpart_ref[...] = jnp.zeros_like(lpart_ref)


# ---------------------------------------------------------------------------
# Parameter preparation (pad + cast ONCE, not per forward)
# ---------------------------------------------------------------------------
def prepare_graft_params(params):
    w1 = jnp.asarray(params["w1"], jnp.float32)
    b1 = jnp.asarray(params["b1"], jnp.float32).reshape(1, -1)
    w2 = jnp.asarray(params["w2"], jnp.float32)
    b2 = jnp.asarray(params["b2"], jnp.float32).reshape(1, -1)
    cw = jnp.asarray(params["class_weights"], jnp.float32).reshape(1, -1)

    K, F = w1.shape
    F2, C = w2.shape
    assert F2 == F, (F2, F)
    Kp, Fp, Cp = _round_up(K, 128), _round_up(F, 128), _round_up(C, 128)

    return {
        "w1": _pad2d(w1, Kp, Fp).astype(jnp.bfloat16),
        "b1": _pad2d(b1, 1, Fp),
        "w2": _pad2d(w2, Fp, Cp).astype(jnp.bfloat16),
        "b2": _pad2d(b2, 1, Cp),
        "cw": _pad2d(cw, 1, Cp),
        "col_mask": (jnp.arange(Cp) < C).astype(jnp.float32).reshape(1, Cp),
        "dims": (K, F, C, Kp, Fp, Cp),
    }


# ---------------------------------------------------------------------------
# GRAFT forward (enable_graph=False branch)
# ---------------------------------------------------------------------------
def graft_forward(images, labels, prep, cfg):
    B = images.shape[0]
    K, F, C, Kp, Fp, Cp = prep["dims"]

    x = images.reshape(B, -1).astype(jnp.float32)   # NCHW -> (B, C*H*W)
    assert x.shape[1] == K, (x.shape, K)

    Mp = _round_up(B, 16)                           # bf16 LHS: 16-row packing
    tm, tk, est = _choose_tiles(Mp, Kp, Fp, Cp)

    xp = _pad2d(x, Mp, Kp).astype(jnp.bfloat16)
    row_mask = (jnp.arange(Mp) < B).astype(jnp.float32).reshape(Mp, 1)

    compute_loss = labels is not None
    if compute_loss:
        tp = _pad2d(jnp.asarray(labels, jnp.float32), Mp, Cp)
    else:
        tp = jnp.zeros((Mp, Cp), jnp.float32)

    kernel = functools.partial(
        _graft_fused_kernel,
        gamma=float(cfg["FL_GAMMA"]), beta=float(cfg["ASL_BETA"]),
        wbce_w=float(cfg["WBCE_WEIGHT"]), fl_w=float(cfg["FL_WEIGHT"]),
        asl_w=float(cfg["ASL_WEIGHT"]), compute_loss=compute_loss)

    grid = (Mp // tm, Kp // tk)
    cost = pl.CostEstimate(
        flops=2 * Mp * Kp * Fp + 2 * Mp * Fp * Cp + 30 * Mp * Cp,
        transcendentals=2 * Mp * Cp,
        bytes_accessed=int(Mp * Kp * 2 + Kp * Fp * 2 + Fp * Cp * 2
                           + Mp * Cp * 4 + Mp * Fp * 4 + Mp * Cp * 4
                           + Mp * 128 * 4 + (Fp + 3 * Cp + Mp) * 4),
    )
    vmem_limit = int(min(64 * 1024 * 1024, max(32 * 1024 * 1024, 2 * est)))

    feat_pad, logits_pad, loss_part = pl.pallas_call(
        kernel,
        out_shape=(jax.ShapeDtypeStruct((Mp, Fp), jnp.float32),
                   jax.ShapeDtypeStruct((Mp, Cp), jnp.float32),
                   jax.ShapeDtypeStruct((Mp, 128), jnp.float32)),
        grid_spec=pltpu.PrefetchScalarGridSpec(
            num_scalar_prefetch=0,
            grid=grid,
            in_specs=[
                pl.BlockSpec((tm, tk), lambda i, k: (i, k)),    # x
                pl.BlockSpec((tk, Fp), lambda i, k: (k, 0)),    # w1
                pl.BlockSpec((1, Fp), lambda i, k: (0, 0)),     # b1
                pl.BlockSpec((Fp, Cp), lambda i, k: (0, 0)),    # w2 (resident)
                pl.BlockSpec((1, Cp), lambda i, k: (0, 0)),     # b2
                pl.BlockSpec((tm, Cp), lambda i, k: (i, 0)),    # targets
                pl.BlockSpec((1, Cp), lambda i, k: (0, 0)),     # class weights
                pl.BlockSpec((1, Cp), lambda i, k: (0, 0)),     # column mask
                pl.BlockSpec((tm, 1), lambda i, k: (i, 0)),     # row mask
            ],
            out_specs=[
                pl.BlockSpec((tm, Fp), lambda i, k: (i, 0)),    # features
                pl.BlockSpec((tm, Cp), lambda i, k: (i, 0)),    # logits
                pl.BlockSpec((tm, 128), lambda i, k: (i, 0)),   # per-row loss sums
            ],
            scratch_shapes=[pltpu.VMEM((tm, Fp), jnp.float32)],
        ),
        compiler_params=pltpu.CompilerParams(
            dimension_semantics=("parallel", "arbitrary"),
            vmem_limit_bytes=vmem_limit),
        cost_estimate=cost,
    )(xp, prep["w1"], prep["b1"], prep["w2"], prep["b2"],
      tp, prep["cw"], prep["col_mask"], row_mask)

    features = feat_pad[:B, :F]
    logits = logits_pad[:B, :C]
    loss = None
    if compute_loss:
        # Per-row partial sums (padded rows/cols masked in-kernel) -> mean.
        loss = jnp.sum(loss_part[:, 0]) / jnp.float32(B * C)
    return {"logits": logits, "features": features, "loss": loss}


# ---------------------------------------------------------------------------
# Pure-JAX references (for correctness sanity checks)
# ---------------------------------------------------------------------------
def _ref_backbone_bf16(images, params):
    """Matches the kernel's bf16-in / f32-accumulate matmul path."""
    B = images.shape[0]
    x = images.reshape(B, -1).astype(jnp.float32)
    feat = jnp.dot(x.astype(jnp.bfloat16), params["w1"].astype(jnp.bfloat16),
                   preferred_element_type=jnp.float32) + params["b1"]
    logits = jnp.dot(feat.astype(jnp.bfloat16), params["w2"].astype(jnp.bfloat16),
                     preferred_element_type=jnp.float32) + params["b2"]
    return feat, logits


def _ref_backbone_f32(images, params):
    B = images.shape[0]
    x = images.reshape(B, -1).astype(jnp.float32)
    feat = x @ params["w1"] + params["b1"]
    logits = feat @ params["w2"] + params["b2"]
    return feat, logits


def _ref_loss(logits, targets, class_weights, cfg):
    x = logits.astype(jnp.float32)
    t = targets.astype(jnp.float32)
    bce = jnp.maximum(x, 0.0) - x * t + jnp.log1p(jnp.exp(-jnp.abs(x)))
    p = jax.nn.sigmoid(x)
    wbce = bce * class_weights[None, :]
    pt = t * p + (1 - t) * (1 - p)
    fl = bce * (1 - pt) ** cfg["FL_GAMMA"]
    asl = t * bce + (1 - t) * bce * p ** cfg["ASL_BETA"]
    comb = (cfg["WBCE_WEIGHT"] * wbce + cfg["FL_WEIGHT"] * fl
            + cfg["ASL_WEIGHT"] * asl)
    return jnp.mean(comb)


if __name__ == "__main__":
    # Small shapes consistent with the module's forward contract.
    B, C_in, H, W = 2, 3, 16, 16          # images (B, C, H, W), NCHW
    FEATURE_DIM = 192                     # backbone.embed_dim (stub)
    NUM_CLASSES = 16

    cfg = {
        "FL_GAMMA": 2.0,
        "ASL_BETA": 4.0,
        "WBCE_WEIGHT": 0.5,
        "FL_WEIGHT": 0.25,
        "ASL_WEIGHT": 0.25,
    }

    key = jax.random.PRNGKey(0)
    k_img, k_lbl, k_w1, k_b1, k_w2, k_b2 = jax.random.split(key, 6)

    images = jax.random.normal(k_img, (B, C_in, H, W), dtype=jnp.float32)
    labels = jax.random.bernoulli(k_lbl, 0.3, (B, NUM_CLASSES)).astype(jnp.float32)

    D_in = C_in * H * W
    params = {
        "w1": 0.02 * jax.random.normal(k_w1, (D_in, FEATURE_DIM), dtype=jnp.float32),
        "b1": 0.01 * jax.random.normal(k_b1, (1, FEATURE_DIM), dtype=jnp.float32),
        "w2": 0.02 * jax.random.normal(k_w2, (FEATURE_DIM, NUM_CLASSES), dtype=jnp.float32),
        "b2": 0.01 * jax.random.normal(k_b2, (1, NUM_CLASSES), dtype=jnp.float32),
        "class_weights": jnp.ones((NUM_CLASSES,), dtype=jnp.float32),
    }

    prep = prepare_graft_params(params)   # pad/cast once (not per forward)

    out = graft_forward(images, labels, prep, cfg)
    jax.block_until_ready(out["loss"])
    jax.block_until_ready(out["logits"])
    jax.block_until_ready(out["features"])

    assert out["logits"].shape == (B, NUM_CLASSES)
    assert out["features"].shape == (B, FEATURE_DIM)

    # 1) Tight check of the matmul plumbing against a bf16-consistent reference.
    ref_feat, ref_logits = _ref_backbone_bf16(images, params)
    assert jnp.allclose(out["features"], ref_feat, atol=1e-3, rtol=1e-3)
    assert jnp.allclose(out["logits"], ref_logits, atol=1e-3, rtol=1e-3)

    # 2) Tight check of the loss math on the kernel's own logits.
    ref_loss_tight = _ref_loss(out["logits"], labels, params["class_weights"], cfg)
    assert jnp.allclose(out["loss"], ref_loss_tight, atol=2e-5, rtol=2e-5)

    # 3) Loose end-to-end check against the full-f32 (PyTorch-faithful) path
    #    (differences come only from the bf16 MXU inputs).
    f32_feat, f32_logits = _ref_backbone_f32(images, params)
    f32_loss = _ref_loss(f32_logits, labels, params["class_weights"], cfg)
    assert jnp.allclose(out["logits"], f32_logits, atol=2e-2)
    assert jnp.allclose(out["features"], f32_feat, atol=3e-2)
    assert jnp.allclose(out["loss"], f32_loss, atol=2e-2)

    print("KERNEL_OK")
</pallas_src>

<mosaic_0001>
module attributes {stable_mosaic.version = 11 : i64} {
  func.func @_graft_fused_kernel(%arg0: i32, %arg1: i32, %arg2: memref<16x768xbf16, #tpu.memory_space<vmem>>, %arg3: memref<768x256xbf16, #tpu.memory_space<vmem>>, %arg4: memref<1x256xf32, #tpu.memory_space<vmem>>, %arg5: memref<256x128xbf16, #tpu.memory_space<vmem>>, %arg6: memref<1x128xf32, #tpu.memory_space<vmem>>, %arg7: memref<16x128xf32, #tpu.memory_space<vmem>>, %arg8: memref<1x128xf32, #tpu.memory_space<vmem>>, %arg9: memref<1x128xf32, #tpu.memory_space<vmem>>, %arg10: memref<16x1xf32, #tpu.memory_space<vmem>>, %arg11: memref<16x256xf32, #tpu.memory_space<vmem>>, %arg12: memref<16x128xf32, #tpu.memory_space<vmem>>, %arg13: memref<16x128xf32, #tpu.memory_space<vmem>>, %arg14: memref<16x256xf32, #tpu.memory_space<vmem>>) attributes {dimension_semantics = [#tpu.dimension_semantics<parallel>, #tpu.dimension_semantics<arbitrary>], iteration_bounds = array<i64: 1, 1>, scalar_prefetch = 0 : i64, scratch_operands = 1 : i64, tpu.core_type = #tpu.core_type<tc>, window_params = [{transform_indices = @transform_0, window_bounds = array<i64: 16, 768>}, {transform_indices = @transform_1, window_bounds = array<i64: 768, 256>}, {pipeline_mode = #tpu.pipeline_mode<synchronous>, transform_indices = @transform_2, window_bounds = array<i64: 1, 256>}, {pipeline_mode = #tpu.pipeline_mode<synchronous>, transform_indices = @transform_3, window_bounds = array<i64: 256, 128>}, {pipeline_mode = #tpu.pipeline_mode<synchronous>, transform_indices = @transform_4, window_bounds = array<i64: 1, 128>}, {transform_indices = @transform_5, window_bounds = array<i64: 16, 128>}, {pipeline_mode = #tpu.pipeline_mode<synchronous>, transform_indices = @transform_6, window_bounds = array<i64: 1, 128>}, {pipeline_mode = #tpu.pipeline_mode<synchronous>, transform_indices = @transform_7, window_bounds = array<i64: 1, 128>}, {transform_indices = @transform_8, window_bounds = array<i64: 16, 1>}, {transform_indices = @transform_9, window_bounds = array<i64: 16, 256>}, {transform_indices = @transform_10, window_bounds = array<i64: 16, 128>}, {transform_indices = @transform_11, window_bounds = array<i64: 16, 128>}]} {
    %c0_i32 = arith.constant 0 : i32
    %0 = arith.cmpi eq, %arg1, %c0_i32 : i32
    %1 = arith.extui %0 : i1 to i32
    %c0_i32_0 = arith.constant 0 : i32
    %2 = arith.cmpi ne, %1, %c0_i32_0 : i32
    scf.if %2 {
      %cst_10 = arith.constant 0.000000e+00 : f32
      %12 = vector.broadcast %cst_10 : f32 to vector<16x256xf32>
      %c0_11 = arith.constant 0 : index
      %c0_12 = arith.constant 0 : index
      %13 = vector.load %arg14[%c0_11, %c0_12] : memref<16x256xf32, #tpu.memory_space<vmem>>, vector<16x256xf32>
      tpu.vector_store %arg14[%c0_11, %c0_12], %12 {strides = array<i32>} : memref<16x256xf32, #tpu.memory_space<vmem>>, vector<16x256xf32>,
    } else {
    }
    %c0 = arith.constant 0 : index
    %c0_1 = arith.constant 0 : index
    %3 = vector.load %arg14[%c0, %c0_1] : memref<16x256xf32, #tpu.memory_space<vmem>>, vector<16x256xf32>
    %c0_2 = arith.constant 0 : index
    %c0_3 = arith.constant 0 : index
    %4 = vector.load %arg2[%c0_2, %c0_3] : memref<16x768xbf16, #tpu.memory_space<vmem>>, vector<16x768xbf16>
    %c0_4 = arith.constant 0 : index
    %c0_5 = arith.constant 0 : index
    %5 = vector.load %arg3[%c0_4, %c0_5] : memref<768x256xbf16, #tpu.memory_space<vmem>>, vector<768x256xbf16>
    %cst = arith.constant dense<0.000000e+00> : vector<16x256xf32>
    %6 = tpu.matmul %4, %5, %cst {dimension_numbers = #tpu.dot_dimension_numbers<[1], [0], [0], [1], [0, 0, 1, 1], [], []>} : vector<16x768xbf16>, vector<768x256xbf16>, vector<16x256xf32> -> vector<16x256xf32>
    %7 = arith.addf %3, %6 : vector<16x256xf32>
    %c0_6 = arith.constant 0 : index
    %c0_7 = arith.constant 0 : index
    %8 = vector.load %arg14[%c0_6, %c0_7] : memref<16x256xf32, #tpu.memory_space<vmem>>, vector<16x256xf32>
    tpu.vector_store %arg14[%c0_6, %c0_7], %7 {strides = array<i32>} : memref<16x256xf32, #tpu.memory_space<vmem>>, vector<16x256xf32>,
    %c0_i32_8 = arith.constant 0 : i32
    %9 = arith.cmpi eq, %arg1, %c0_i32_8 : i32
    %10 = arith.extui %9 : i1 to i32
    %c0_i32_9 = arith.constant 0 : i32
    %11 = arith.cmpi ne, %10, %c0_i32_9 : i32
    scf.if %11 {
      %c0_10 = arith.constant 0 : index
      %c0_11 = arith.constant 0 : index
      %12 = vector.load %arg14[%c0_10, %c0_11] : memref<16x256xf32, #tpu.memory_space<vmem>>, vector<16x256xf32>
      %c0_12 = arith.constant 0 : index
      %c0_13 = arith.constant 0 : index
      %13 = vector.load %arg4[%c0_12, %c0_13] : memref<1x256xf32, #tpu.memory_space<vmem>>, vector<1x256xf32>
      %14 = vector.broadcast %13 : vector<1x256xf32> to vector<16x256xf32>
      %15 = arith.addf %12, %14 : vector<16x256xf32>
      %c0_14 = arith.constant 0 : index
      %c0_15 = arith.constant 0 : index
      %16 = vector.load %arg11[%c0_14, %c0_15] : memref<16x256xf32, #tpu.memory_space<vmem>>, vector<16x256xf32>
      tpu.vector_store %arg11[%c0_14, %c0_15], %15 {strides = array<i32>} : memref<16x256xf32, #tpu.memory_space<vmem>>, vector<16x256xf32>,
      %17 = arith.truncf %15 : vector<16x256xf32> to vector<16x256xbf16>
      %c0_16 = arith.constant 0 : index
      %c0_17 = arith.constant 0 : index
      %18 = vector.load %arg5[%c0_16, %c0_17] : memref<256x128xbf16, #tpu.memory_space<vmem>>, vector<256x128xbf16>
      %cst_18 = arith.constant dense<0.000000e+00> : vector<16x128xf32>
      %19 = tpu.matmul %17, %18, %cst_18 {dimension_numbers = #tpu.dot_dimension_numbers<[1], [0], [0], [1], [0, 0, 1, 1], [], []>} : vector<16x256xbf16>, vector<256x128xbf16>, vector<16x128xf32> -> vector<16x128xf32>
      %c0_19 = arith.constant 0 : index
      %c0_20 = arith.constant 0 : index
      %20 = vector.load %arg6[%c0_19, %c0_20] : memref<1x128xf32, #tpu.memory_space<vmem>>, vector<1x128xf32>
      %21 = vector.broadcast %20 : vector<1x128xf32> to vector<16x128xf32>
      %22 = arith.addf %19, %21 : vector<16x128xf32>
      %c0_21 = arith.constant 0 : index
      %c0_22 = arith.constant 0 : index
      %23 = vector.load %arg12[%c0_21, %c0_22] : memref<16x128xf32, #tpu.memory_space<vmem>>, vector<16x128xf32>
      tpu.vector_store %arg12[%c0_21, %c0_22], %22 {strides = array<i32>} : memref<16x128xf32, #tpu.memory_space<vmem>>, vector<16x128xf32>,
      %c0_23 = arith.constant 0 : index
      %c0_24 = arith.constant 0 : index
      %24 = vector.load %arg7[%c0_23, %c0_24] : memref<16x128xf32, #tpu.memory_space<vmem>>, vector<16x128xf32>
      %c0_25 = arith.constant 0 : index
      %c0_26 = arith.constant 0 : index
      %25 = vector.load %arg8[%c0_25, %c0_26] : memref<1x128xf32, #tpu.memory_space<vmem>>, vector<1x128xf32>
      %c0_27 = arith.constant 0 : index
      %c0_28 = arith.constant 0 : index
      %26 = vector.load %arg10[%c0_27, %c0_28] : memref<16x1xf32, #tpu.memory_space<vmem>>, vector<16x1xf32>
      %c0_29 = arith.constant 0 : index
      %c0_30 = arith.constant 0 : index
      %27 = vector.load %arg9[%c0_29, %c0_30] : memref<1x128xf32, #tpu.memory_space<vmem>>, vector<1x128xf32>
      %28 = vector.broadcast %26 : vector<16x1xf32> to vector<16x128xf32>
      %29 = vector.broadcast %27 : vector<1x128xf32> to vector<16x128xf32>
      %30 = arith.mulf %28, %29 : vector<16x128xf32>
      %31 = math.absf %22 : vector<16x128xf32>
      %cst_31 = arith.constant 0.000000e+00 : f32
      %32 = vector.broadcast %cst_31 : f32 to vector<16x128xf32>
      %33 = arith.subf %32, %31 : vector<16x128xf32>
      %34 = math.exp %33 : vector<16x128xf32>
      %cst_32 = arith.constant 0.000000e+00 : f32
      %35 = vector.broadcast %cst_32 : f32 to vector<16x128xf32>
      %36 = arith.maximumf %22, %35 : vector<16x128xf32>
      %37 = arith.mulf %22, %24 : vector<16x128xf32>
      %38 = arith.subf %36, %37 : vector<16x128xf32>
      %39 = math.log1p %34 : vector<16x128xf32>
      %40 = arith.addf %38, %39 : vector<16x128xf32>
      %cst_33 = arith.constant 1.000000e+00 : f32
      %41 = vector.broadcast %cst_33 : f32 to vector<16x128xf32>
      %42 = arith.addf %41, %34 : vector<16x128xf32>
      %cst_34 = arith.constant 1.000000e+00 : f32
      %43 = vector.broadcast %cst_34 : f32 to vector<16x128xf32>
      %44 = arith.divf %43, %42 : vector<16x128xf32>
      %cst_35 = arith.constant 0.000000e+00 : f32
      %45 = vector.broadcast %cst_35 : f32 to vector<16x128xf32>
      %46 = arith.cmpf oge, %22, %45 : vector<16x128xf32>
      %47 = arith.mulf %34, %44 : vector<16x128xf32>
      %48 = arith.select %46, %44, %47 : vector<16x128xi1>, vector<16x128xf32>
      %49 = arith.mulf %24, %48 : vector<16x128xf32>
      %cst_36 = arith.constant 1.000000e+00 : f32
      %50 = vector.broadcast %cst_36 : f32 to vector<16x128xf32>
      %51 = arith.subf %50, %24 : vector<16x128xf32>
      %cst_37 = arith.constant 1.000000e+00 : f32
      %52 = vector.broadcast %cst_37 : f32 to vector<16x128xf32>
      %53 = arith.subf %52, %48 : vector<16x128xf32>
      %54 = arith.mulf %51, %53 : vector<16x128xf32>
      %55 = arith.addf %49, %54 : vector<16x128xf32>
      %cst_38 = arith.constant 1.000000e+00 : f32
      %56 = vector.broadcast %cst_38 : f32 to vector<16x128xf32>
      %57 = arith.subf %56, %55 : vector<16x128xf32>
      %58 = arith.mulf %57, %57 : vector<16x128xf32>
      %59 = arith.mulf %48, %48 : vector<16x128xf32>
      %60 = arith.mulf %59, %59 : vector<16x128xf32>
      %cst_39 = arith.constant 5.000000e-01 : f32
      %61 = vector.broadcast %cst_39 : f32 to vector<1x128xf32>
      %62 = arith.mulf %61, %25 : vector<1x128xf32>
      %cst_40 = arith.constant 2.500000e-01 : f32
      %63 = vector.broadcast %cst_40 : f32 to vector<16x128xf32>
      %64 = arith.mulf %63, %58 : vector<16x128xf32>
      %65 = vector.broadcast %62 : vector<1x128xf32> to vector<16x128xf32>
      %66 = arith.addf %65, %64 : vector<16x128xf32>
      %cst_41 = arith.constant 1.000000e+00 : f32
      %67 = vector.broadcast %cst_41 : f32 to vector<16x128xf32>
      %68 = arith.subf %67, %24 : vector<16x128xf32>
      %69 = arith.mulf %68, %60 : vector<16x128xf32>
      %70 = arith.addf %24, %69 : vector<16x128xf32>
      %cst_42 = arith.constant 2.500000e-01 : f32
      %71 = vector.broadcast %cst_42 : f32 to vector<16x128xf32>
      %72 = arith.mulf %71, %70 : vector<16x128xf32>
      %73 = arith.addf %66, %72 : vector<16x128xf32>
      %74 = arith.mulf %40, %73 : vector<16x128xf32>
      %75 = arith.mulf %74, %30 : vector<16x128xf32>
      %cst_43 = arith.constant dense<0.000000e+00> : vector<16xf32>
      %76 = vector.multi_reduction <add>, %75, %cst_43 [1] : vector<16x128xf32> to vector<16xf32>
      %77 = vector.shape_cast %76 : vector<16xf32> to vector<16x1xf32>
      %78 = vector.shape_cast %77 : vector<16x1xf32> to vector<16x1xf32>
      %79 = vector.broadcast %78 : vector<16x1xf32> to vector<16x128xf32>
      %c0_44 = arith.constant 0 : index
      %c0_45 = arith.constant 0 : index
      %80 = vector.load %arg13[%c0_44, %c0_45] : memref<16x128xf32, #tpu.memory_space<vmem>>, vector<16x128xf32>
      tpu.vector_store %arg13[%c0_44, %c0_45], %79 {strides = array<i32>} : memref<16x128xf32, #tpu.memory_space<vmem>>, vector<16x128xf32>,
    } else {
    }
    return
  }
  func.func @transform_0(%arg0: i32, %arg1: i32) -> (i32, i32) {
    %c0_i32 = arith.constant 0 : i32
    return %arg0, %arg1 : i32, i32
  }
  func.func @transform_1(%arg0: i32, %arg1: i32) -> (i32, i32) {
    %c0_i32 = arith.constant 0 : i32
    %c0_i32_0 = arith.constant 0 : i32
    return %arg1, %c0_i32 : i32, i32
  }
  func.func @transform_2(%arg0: i32, %arg1: i32) -> (i32, i32) {
    %c0_i32 = arith.constant 0 : i32
    %c0_i32_0 = arith.constant 0 : i32
    %c0_i32_1 = arith.constant 0 : i32
    return %c0_i32, %c0_i32_0 : i32, i32
  }
  func.func @transform_3(%arg0: i32, %arg1: i32) -> (i32, i32) {
    %c0_i32 = arith.constant 0 : i32
    %c0_i32_0 = arith.constant 0 : i32
    %c0_i32_1 = arith.constant 0 : i32
    return %c0_i32, %c0_i32_0 : i32, i32
  }
  func.func @transform_4(%arg0: i32, %arg1: i32) -> (i32, i32) {
    %c0_i32 = arith.constant 0 : i32
    %c0_i32_0 = arith.constant 0 : i32
    %c0_i32_1 = arith.constant 0 : i32
    return %c0_i32, %c0_i32_0 : i32, i32
  }
  func.func @transform_5(%arg0: i32, %arg1: i32) -> (i32, i32) {
    %c0_i32 = arith.constant 0 : i32
    %c0_i32_0 = arith.constant 0 : i32
    return %arg0, %c0_i32 : i32, i32
  }
  func.func @transform_6(%arg0: i32, %arg1: i32) -> (i32, i32) {
    %c0_i32 = arith.constant 0 : i32
    %c0_i32_0 = arith.constant 0 : i32
    %c0_i32_1 = arith.constant 0 : i32
    return %c0_i32, %c0_i32_0 : i32, i32
  }
  func.func @transform_7(%arg0: i32, %arg1: i32) -> (i32, i32) {
    %c0_i32 = arith.constant 0 : i32
    %c0_i32_0 = arith.constant 0 : i32
    %c0_i32_1 = arith.constant 0 : i32
    return %c0_i32, %c0_i32_0 : i32, i32
  }
  func.func @transform_8(%arg0: i32, %arg1: i32) -> (i32, i32) {
    %c0_i32 = arith.constant 0 : i32
    %c0_i32_0 = arith.constant 0 : i32
    return %arg0, %c0_i32 : i32, i32
  }
  func.func @transform_9(%arg0: i32, %arg1: i32) -> (i32, i32) {
    %c0_i32 = arith.constant 0 : i32
    %c0_i32_0 = arith.constant 0 : i32
    return %arg0, %c0_i32 : i32, i32
  }
  func.func @transform_10(%arg0: i32, %arg1: i32) -> (i32, i32) {
    %c0_i32 = arith.constant 0 : i32
    %c0_i32_0 = arith.constant 0 : i32
    return %arg0, %c0_i32 : i32, i32
  }
  func.func @transform_11(%arg0: i32, %arg1: i32) -> (i32, i32) {
    %c0_i32 = arith.constant 0 : i32
    %c0_i32_0 = arith.constant 0 : i32
    return %arg0, %c0_i32 : i32, i32
  }
}

</mosaic_0001>

<bundles_post_ra>
// kernel: tpu_custom_call.1
= control target key start
LH: loop header
LB: loop body
LE: loop exit
PB: predicated region body
PF: predicated region fallthrough
CT: control target
= control target key end

     0   :  { %17 = vsyncpa [#allocation4], 0  ;;  %s1909_s0 = inlined_call_operand.hbm [shape: bf16[16,768], index: 0, kind: input, shape index: {}]   ;;  %s1910_s1 = inlined_call_operand.hbm [shape: bf16[768,256], index: 1, kind: input, shape index: {}]   ;;  %s1911_s2 = inlined_call_operand.vmem [shape: f32[1,256], index: 2, kind: input, shape index: {}]   ;;  %s1912_s3 = inlined_call_operand.hbm [shape: bf16[256,128], index: 3, kind: input, shape index: {}]   ;;  %s1913_s4 = inlined_call_operand.vmem [shape: f32[1,128], index: 4, kind: input, shape index: {}]   ;;  %s1914_s5 = inlined_call_operand.vmem [shape: f32[16,128], index: 5, kind: input, shape index: {}]   ;;  %s1915_s6 = inlined_call_operand.vmem [shape: f32[1,128], index: 6, kind: input, shape index: {}]   ;;  %s1916_s7 = inlined_call_operand.vmem [shape: f32[1,128], index: 7, kind: input, shape index: {}]   ;;  %s1917_s8 = inlined_call_operand.vmem [shape: f32[16,1], index: 8, kind: input, shape index: {}]   ;;  %s1918_s9 = inlined_call_operand.hbm [shape: f32[16,256], index: 9, kind: output, shape index: {0}]   ;;  %s1919_s10 = inlined_call_operand.hbm [shape: f32[16,128], index: 10, kind: output, shape index: {1}]   ;;  %s1920_s11 = inlined_call_operand.hbm [shape: f32[16,128], index: 11, kind: output, shape index: {2}]  }
   0x1   :  { %18 = vsyncpa [#allocation7], 0 }
   0x2   :  { %19 = vsyncpa [#allocation5], 0 }
   0x3   :  { %20 = vsyncpa [#allocation11], 0  ;;  %s1700_s17 = smov [#allocation6]   ;;  %s1560_s21 = scalar_lea.hbm %s1910_s1, 12288 }
   0x4   :  { %s38_s18 = sshll.u32 %s1700_s17, 4  ;;  %p1561_p0 = scmp.ne.s32.totalorder %s1910_s1, %s1560_s21  ;;  %s39_s18 = int_to_ptr.vmem [resolvable:$true] %s38_s18 }
   0x5   :  { %p1564_p1 = scmp.lt.u32.totalorder %s1560_s21, %s1910_s1 }
   0x7   :  { %p1566_p2 = pnand %p1564_p1, %p1561_p0 }
   0x9   :  { %1569 = shalt.err (!%p1566_p2)
}
   0xa   :  { %s1570_s26 = scalar_lea.vmem %s39_s18, 12288  ;;  %p1575_p4 = scmp.lt.s32.totalorder %s39_s18, %s39_s18 }
   0xb   :  { %p1571_p3 = scmp.ne.s32.totalorder %s39_s18, %s1570_s26  ;;  %p1576_p5 = scmp.lt.s32.totalorder %s1570_s26, %s1570_s26 }
   0xd   :  { %p1577_p6 = por %p1576_p5, %p1575_p4 }
   0xf   :  { %p1578_p7 = pnand %p1577_p6, %p1571_p3 }
  0x11   :  { %1581 = shalt.err (!%p1578_p7)
}
  0x12   :  { %s1701_s27 = smov 128   ;;  %s1702_s28 = smov 8  }
  0x13   :  { %44 = dma.hbm_to_vmem [thread:$0]  %s1910_s1, 12288, %s39_s18, [#allocation7], %s1701_s27, %s1701_s27, %s1702_s28  }
  0x14   :  { %s1703_s12 = smov [#allocation3]   ;;  %s1582_s16 = scalar_lea.hbm %s1909_s0, 768 }
  0x15   :  { %s26_s13 = sshll.u32 %s1703_s12, 4  ;;  %p1583_p8 = scmp.ne.s32.totalorder %s1909_s0, %s1582_s16  ;;  %s27_s13 = int_to_ptr.vmem [resolvable:$true] %s26_s13 }
  0x16   :  { %p1586_p9 = scmp.lt.u32.totalorder %s1582_s16, %s1909_s0 }
  0x18   :  { %p1588_p10 = pnand %p1586_p9, %p1583_p8 }
  0x1a   :  { %1591 = shalt.err (!%p1588_p10)
}
  0x1b   :  { %s1592_s22 = scalar_lea.vmem %s27_s13, 768  ;;  %p1597_p12 = scmp.lt.s32.totalorder %s27_s13, %s27_s13 }
  0x1c   :  { %p1593_p11 = scmp.ne.s32.totalorder %s27_s13, %s1592_s22  ;;  %p1598_p13 = scmp.lt.s32.totalorder %s1592_s22, %s1592_s22 }
  0x1e   :  { %p1599_p0 = por %p1598_p13, %p1597_p12 }
  0x20   :  { %p1600_p1 = pnand %p1599_p0, %p1593_p11 }
  0x22   :  { %1603 = shalt.err (!%p1600_p1)
}
  0x23   :  { %s1704_s1 = smov 384   ;;  %s1705_s18 = smov 24  }
  0x24   :  { %32 = dma.hbm_to_vmem [thread:$0]  %s1909_s0, 768, %s27_s13, [#allocation4], %s1704_s1, %s1704_s1, %s1705_s18  }
  0x25   :  { %s1706_s25 = smov [#allocation8]   ;;  %s1604_s12 = scalar_lea.hbm %s1912_s3, 2048 }
  0x26   :  { %s52_s26 = sshll.u32 %s1706_s25, 4  ;;  %p1605_p2 = scmp.ne.s32.totalorder %s1912_s3, %s1604_s12  ;;  %s53_s26 = int_to_ptr.vmem [resolvable:$true] %s52_s26 }
  0x27   :  { %p1608_p3 = scmp.lt.u32.totalorder %s1604_s12, %s1912_s3 }
  0x29   :  { %p1610_p4 = pnand %p1608_p3, %p1605_p2 }
  0x2b   :  { %1613 = shalt.err (!%p1610_p4)
}
  0x2c   :  { %s1614_s19 = scalar_lea.vmem %s53_s26, 2048  ;;  %p1619_p6 = scmp.lt.s32.totalorder %s53_s26, %s53_s26 }
  0x2d   :  { %p1615_p5 = scmp.ne.s32.totalorder %s53_s26, %s1614_s19  ;;  %p1620_p7 = scmp.lt.s32.totalorder %s1614_s19, %s1614_s19 }
  0x2f   :  { %p1621_p8 = por %p1620_p7, %p1619_p6 }
  0x31   :  { %p1622_p9 = pnand %p1621_p8, %p1615_p5 }
  0x33   :  { %1625 = shalt.err (!%p1622_p9)
}
  0x34   :  { %s1707_s0 = smov 64   ;;  %s1708_s13 = smov 4  }
  0x35   :  { %58 = dma.hbm_to_vmem [thread:$0]  %s1912_s3, 2048, %s53_s26, [#allocation7], %s1707_s0, %s1707_s0, %s1708_s13  }
  0x36   :  { %1692 = dma.done.wait [#allocation4], 768  }
  0x37   :  { %1693 = vsyncadd [#allocation4], 4294966528 }
  0x38   :  { %1694 = dma.done.wait [#allocation7], 14336  }
  0x39   :  { %1695 = vsyncadd [#allocation7], 4294952960  ;;  %v1379_v0 = vld [vmem:[#allocation6 + $0x104] ss:$8 sps:$4 sm:$0xff]   ;;  %v1381_v1 = vld [vmem:[#allocation6 + $0x100] ss:$8 sps:$4 sm:$0xff]  }
  0x3a   :  { %746 = vmatprep.subr.bf16.mxu0 %v1379_v0  ;;  %v1382_v2 = vld [vmem:[#allocation6 + $0x114] ss:$8 sps:$4 sm:$0xff]   ;;  %v1384_v3 = vld [vmem:[#allocation6 + $0x110] ss:$8 sps:$4 sm:$0xff]   ;;  %v1385_v4 = vld [vmem:[#allocation6 + $0x124] ss:$8 sps:$4 sm:$0xff]  }
  0x3b   :  { %747 = vmatpush1.bf16.msra.mxu0 %v1381_v1  ;;  %v1387_v5 = vld [vmem:[#allocation6 + $0x120] ss:$8 sps:$4 sm:$0xff]   ;;  %v1388_v6 = vld [vmem:[#allocation6 + $0x134] ss:$8 sps:$4 sm:$0xff]   ;;  %v1390_v7 = vld [vmem:[#allocation6 + $0x130] ss:$8 sps:$4 sm:$0xff]  }
  0x3c   :  { %748 = vmatprep.subr.bf16.mxu0 %v1382_v2  ;;  %v1391_v8 = vld [vmem:[#allocation6 + $0x144] ss:$8 sps:$4 sm:$0xff]   ;;  %v1393_v9 = vld [vmem:[#allocation6 + $0x140] ss:$8 sps:$4 sm:$0xff]   ;;  %v1394_v10 = vld [vmem:[#allocation6 + $0x154] ss:$8 sps:$4 sm:$0xff]  }
  0x3d   :  { %v1396_v11 = vld [vmem:[#allocation6 + $0x150] ss:$8 sps:$4 sm:$0xff]   ;;  %v1397_v12 = vld [vmem:[#allocation6 + $0x164] ss:$8 sps:$4 sm:$0xff]   ;;  %v1429_v14 = vld [vmem:[#allocation6] ss:$8 sps:$4 sm:$0xff]  }
  0x3e   :  { %v1426_v13 = vld [vmem:[#allocation6 + $0x4] ss:$8 sps:$4 sm:$0xff]   ;;  %v1399_v15 = vld [vmem:[#allocation6 + $0x160] ss:$8 sps:$4 sm:$0xff]   ;;  %v1432_v16 = vld [vmem:[#allocation3 + $0xc] ss:$24 sps:$4 sm:$0xff]  }
  0x3f   :  { %749 = vmatpush1.bf16.msra.mxu0 %v1384_v3  ;;  %703 = vmatprep.subr.bf16.mxu1 %v1426_v13  ;;  %v1400_v17 = vld [vmem:[#allocation6 + $0x174] ss:$8 sps:$4 sm:$0xff]   ;;  %v1438_v19 = vld [vmem:[#allocation6 + $0x10] ss:$8 sps:$4 sm:$0xff]   ;;  %v1403_v21 = vld [vmem:[#allocation6 + $0x184] ss:$8 sps:$4 sm:$0xff]  }
  0x40   :  { %750 = vmatprep.subr.bf16.mxu0 %v1385_v4  ;;  %704 = vmatpush1.bf16.msra.mxu1 %v1429_v14  ;;  %v1436_v18 = vld [vmem:[#allocation6 + $0x14] ss:$8 sps:$4 sm:$0xff]   ;;  %v1402_v20 = vld [vmem:[#allocation6 + $0x170] ss:$8 sps:$4 sm:$0xff]   ;;  %v1442_v22 = vld [vmem:[#allocation6 + $0x24] ss:$8 sps:$4 sm:$0xff]  }
  0x41   :  { %778 = vmatprep.mubr.bf16.mxu0 %v1432_v16  ;;  %705 = vmatprep.subr.bf16.mxu1 %v1436_v18  ;;  %v1444_v23 = vld [vmem:[#allocation6 + $0x20] ss:$8 sps:$4 sm:$0xff]   ;;  %v1448_v25 = vld [vmem:[#allocation6 + $0x34] ss:$8 sps:$4 sm:$0xff]   ;;  %v1450_v27 = vld [vmem:[#allocation6 + $0x30] ss:$8 sps:$4 sm:$0xff]  }
  0x42   :  { %v1405_v24 = vld [vmem:[#allocation6 + $0x180] ss:$8 sps:$4 sm:$0xff]   ;;  %v1406_v26 = vld [vmem:[#allocation6 + $0x194] ss:$8 sps:$4 sm:$0xff]   ;;  %v1454_v28 = vld [vmem:[#allocation6 + $0x44] ss:$8 sps:$4 sm:$0xff]  }
  0x43   :  { %751 = vmatpush1.bf16.msra.mxu0 %v1387_v5  ;;  %v1408_v29 = vld [vmem:[#allocation6 + $0x190] ss:$8 sps:$4 sm:$0xff]   ;;  %v1409_v30 = vld [vmem:[#allocation6 + $0x1a4] ss:$8 sps:$4 sm:$0xff]   ;;  %v1456_v31 = vld [vmem:[#allocation6 + $0x40] ss:$8 sps:$4 sm:$0xff]  }
  0x44   :  { %752 = vmatprep.subr.bf16.mxu0 %v1388_v6  ;;  %706 = vmatpush1.bf16.msra.mxu1 %v1438_v19  ;;  %v1460_v32 = vld [vmem:[#allocation6 + $0x54] ss:$8 sps:$4 sm:$0xff]   ;;  %v1411_v33 = vld [vmem:[#allocation6 + $0x1a0] ss:$8 sps:$4 sm:$0xff]   ;;  %v1462_v35 = vld [vmem:[#allocation6 + $0x50] ss:$8 sps:$4 sm:$0xff]  }
  0x45   :  { %707 = vmatprep.subr.bf16.mxu1 %v1442_v22  ;;  %v1412_v34 = vld [vmem:[#allocation6 + $0x1b4] ss:$8 sps:$4 sm:$0xff]   ;;  %v1466_v36 = vld [vmem:[#allocation6 + $0x64] ss:$8 sps:$4 sm:$0xff]   ;;  %v1414_v37 = vld [vmem:[#allocation6 + $0x1b0] ss:$8 sps:$4 sm:$0xff]  }
  0x46   :  { %v1415_v38 = vld [vmem:[#allocation6 + $0x1c4] ss:$8 sps:$4 sm:$0xff]   ;;  %v1468_v39 = vld [vmem:[#allocation6 + $0x60] ss:$8 sps:$4 sm:$0xff]   ;;  %v1472_v40 = vld [vmem:[#allocation6 + $0x74] ss:$8 sps:$4 sm:$0xff]  }
  0x47   :  { %753 = vmatpush1.bf16.msra.mxu0 %v1390_v7  ;;  %v1417_v41 = vld [vmem:[#allocation6 + $0x1c0] ss:$8 sps:$4 sm:$0xff]   ;;  %v1418_v42 = vld [vmem:[#allocation6 + $0x1d4] ss:$8 sps:$4 sm:$0xff]   ;;  %v1474_v43 = vld [vmem:[#allocation6 + $0x70] ss:$8 sps:$4 sm:$0xff]  }
  0x48   :  { %754 = vmatprep.subr.bf16.mxu0 %v1391_v8  ;;  %708 = vmatpush1.bf16.msra.mxu1 %v1444_v23  ;;  %v1478_v44 = vld [vmem:[#allocation6 + $0x84] ss:$8 sps:$4 sm:$0xff]   ;;  %v1420_v45 = vld [vmem:[#allocation6 + $0x1d0] ss:$8 sps:$4 sm:$0xff]   ;;  %v1480_v47 = vld [vmem:[#allocation6 + $0x80] ss:$8 sps:$4 sm:$0xff]  }
  0x49   :  { %709 = vmatprep.subr.bf16.mxu1 %v1448_v25  ;;  %v1421_v46 = vld [vmem:[#allocation6 + $0x1e4] ss:$8 sps:$4 sm:$0xff]   ;;  %v1484_v48 = vld [vmem:[#allocation6 + $0x94] ss:$8 sps:$4 sm:$0xff]   ;;  %v1423_v49 = vld [vmem:[#allocation6 + $0x1e0] ss:$8 sps:$4 sm:$0xff]  }
  0x4a   :  { %v1424_v50 = vld [vmem:[#allocation6 + $0x1f4] ss:$8 sps:$4 sm:$0xff]   ;;  %v1486_v51 = vld [vmem:[#allocation6 + $0x90] ss:$8 sps:$4 sm:$0xff]   ;;  %v1490_v52 = vld [vmem:[#allocation6 + $0xa4] ss:$8 sps:$4 sm:$0xff]  }
  0x4b   :  { %755 = vmatpush1.bf16.msra.mxu0 %v1393_v9  ;;  %v1428_v53 = vld [vmem:[#allocation6 + $0x1f0] ss:$8 sps:$4 sm:$0xff]   ;;  %v1435_v54 = vld [vmem:[#allocation6 + $0x204] ss:$8 sps:$4 sm:$0xff]   ;;  %v1492_v55 = vld [vmem:[#allocation6 + $0xa0] ss:$8 sps:$4 sm:$0xff]  }
  0x4c   :  { %756 = vmatprep.subr.bf16.mxu0 %v1394_v10  ;;  %710 = vmatpush1.bf16.msra.mxu1 %v1450_v27  ;;  %v1430_v56 = vld [vmem:[#allocation3 + $0x8] ss:$24 sps:$4 sm:$0xff]   ;;  %v1496_v57 = vld [vmem:[#allocation6 + $0xb4] ss:$8 sps:$4 sm:$0xff]   ;;  %v1433_v58 = vld [vmem:[#allocation6 + $0x200] ss:$8 sps:$4 sm:$0xff]  }
  0x4d   :  { %711 = vmatprep.subr.bf16.mxu1 %v1454_v28  ;;  %v1441_v59 = vld [vmem:[#allocation6 + $0x214] ss:$8 sps:$4 sm:$0xff]   ;;  %v1498_v60 = vld [vmem:[#allocation6 + $0xb0] ss:$8 sps:$4 sm:$0xff]   ;;  %v1502_v62 = vld [vmem:[#allocation6 + $0xc4] ss:$8 sps:$4 sm:$0xff]  }
  0x4e   :  { %v1525_v61 = vld [vmem:[#allocation3 + $0x4] ss:$24 sps:$4 sm:$0xff]   ;;  %v1439_v63 = vld [vmem:[#allocation6 + $0x210] ss:$8 sps:$4 sm:$0xff]   ;;  %v1531_v0 = vld [vmem:[#allocation3 + $0x14] ss:$24 sps:$4 sm:$0xff]  }
  0x4f   :  { %757 = vmatpush1.bf16.msra.mxu0 %v1396_v11  ;;  %735 = vmatprep.mubr.bf16.mxu1 %v1525_v61  ;;  %v1447_v1 = vld [vmem:[#allocation6 + $0x224] ss:$8 sps:$4 sm:$0xff]   ;;  %v1504_v2 = vld [vmem:[#allocation6 + $0xc0] ss:$8 sps:$4 sm:$0xff]   ;;  %v1508_v3 = vld [vmem:[#allocation6 + $0xd4] ss:$8 sps:$4 sm:$0xff]   ;;  %v849_v61 = vlaneseq }
  0x50   :  { %758 = vmatprep.subr.bf16.mxu0 %v1397_v12  ;;  %712 = vmatpush1.bf16.msra.mxu1 %v1456_v31  ;;  %v1445_v4 = vld [vmem:[#allocation6 + $0x220] ss:$8 sps:$4 sm:$0xff]   ;;  %v1453_v5 = vld [vmem:[#allocation6 + $0x234] ss:$8 sps:$4 sm:$0xff]   ;;  %v1451_v6 = vld [vmem:[#allocation6 + $0x230] ss:$8 sps:$4 sm:$0xff]  }
  0x51   :  { %713 = vmatprep.subr.bf16.mxu1 %v1460_v32  ;;  %v1510_v7 = vld [vmem:[#allocation6 + $0xd0] ss:$8 sps:$4 sm:$0xff]   ;;  %v1514_v8 = vld [vmem:[#allocation6 + $0xe4] ss:$8 sps:$4 sm:$0xff]   ;;  %v1516_v10 = vld [vmem:[#allocation6 + $0xe0] ss:$8 sps:$4 sm:$0xff]  }
  0x52   :  { %v1459_v9 = vld [vmem:[#allocation6 + $0x244] ss:$8 sps:$4 sm:$0xff]   ;;  %v1457_v11 = vld [vmem:[#allocation6 + $0x240] ss:$8 sps:$4 sm:$0xff]   ;;  %v1520_v12 = vld [vmem:[#allocation6 + $0xf4] ss:$8 sps:$4 sm:$0xff]  }
  0x53   :  { %759 = vmatpush1.bf16.msra.mxu0 %v1399_v15  ;;  %v1465_v13 = vld [vmem:[#allocation6 + $0x254] ss:$8 sps:$4 sm:$0xff]   ;;  %v1522_v14 = vld [vmem:[#allocation6 + $0xf0] ss:$8 sps:$4 sm:$0xff]   ;;  %v1532_v15 = vld [vmem:[#allocation8 + $0x40] sm:$0xff]   ;;  %s1711_s15 = smov [#allocation9]  }
  0x54   :  { %760 = vmatprep.subr.bf16.mxu0 %v1400_v17  ;;  %714 = vmatpush1.bf16.msra.mxu1 %v1462_v35  ;;  %v1463_v16 = vld [vmem:[#allocation6 + $0x250] ss:$8 sps:$4 sm:$0xff]   ;;  %v1471_v17 = vld [vmem:[#allocation6 + $0x264] ss:$8 sps:$4 sm:$0xff]   ;;  %v1477_v22 = vld [vmem:[#allocation6 + $0x274] ss:$8 sps:$4 sm:$0xff]  }
  0x55   :  { %715 = vmatprep.subr.bf16.mxu1 %v1466_v36  ;;  %v1523_v18 = vld [vmem:[#allocation3] ss:$24 sps:$4 sm:$0xff]   ;;  %v1533_v19 = vld [vmem:[#allocation8] sm:$0xff]   ;;  %v1538_v28 = vld [vmem:[#allocation8 + $0x58] sm:$0xff]   ;;  %s1169_s16 = sshll.u32 %s1711_s15, 4  ;;  %s1170_s16 = int_to_ptr.vmem [resolvable:$true] %s1169_s16 }
  0x56   :  { %v1535_v23 = vld [vmem:[#allocation8 + $0x8] sm:$0xff]   ;;  %v1475_v25 = vld [vmem:[#allocation6 + $0x270] ss:$8 sps:$4 sm:$0xff]   ;;  %v1540_v32 = vld [vmem:[#allocation8 + $0x60] sm:$0xff]  }
  0x57   :  { %761 = vmatpush1.bf16.msra.mxu0 %v1402_v20  ;;  %v1534_v20 = vld [vmem:[#allocation8 + $0x48] sm:$0xff]   ;;  %v1537_v27 = vld [vmem:[#allocation8 + $0x10] sm:$0xff]   ;;  %v1539_v31 = vld [vmem:[#allocation8 + $0x18] sm:$0xff]  }
  0x58   :  { %762 = vmatprep.subr.bf16.mxu0 %v1403_v21  ;;  %716 = vmatpush1.bf16.msra.mxu1 %v1468_v39  ;;  %v1469_v21 = vld [vmem:[#allocation6 + $0x260] ss:$8 sps:$4 sm:$0xff]   ;;  %v1507_v39 = vld [vmem:[#allocation6 + $0x2c4] ss:$8 sps:$4 sm:$0xff]  }
  0x59   :  { %717 = vmatprep.subr.bf16.mxu1 %v1472_v40  ;;  %v1541_v35 = vld [vmem:[#allocation8 + $0x20] sm:$0xff]  }
  0x5a   :  { %v1493_v36 = vld [vmem:[#allocation6 + $0x2a0] ss:$8 sps:$4 sm:$0xff]  }
  0x5b   :  { %763 = vmatpush1.bf16.msra.mxu0 %v1405_v24  ;;  %v1536_v24 = vld [vmem:[#allocation8 + $0x50] sm:$0xff]   ;;  %v1505_v40 = vld [vmem:[#allocation6 + $0x2c0] ss:$8 sps:$4 sm:$0xff]  }
  0x5c   :  { %764 = vmatprep.subr.bf16.mxu0 %v1406_v26  ;;  %718 = vmatpush1.bf16.msra.mxu1 %v1474_v43  ;;  %v1483_v26 = vld [vmem:[#allocation6 + $0x284] ss:$8 sps:$4 sm:$0xff]  }
  0x5d   :  { %719 = vmatprep.subr.bf16.mxu1 %v1478_v44  ;;  %v1519_v43 = vld [vmem:[#allocation6 + $0x2e4] ss:$8 sps:$4 sm:$0xff]   ;;  %v1517_v44 = vld [vmem:[#allocation6 + $0x2e0] ss:$8 sps:$4 sm:$0xff]  }
  0x5f   :  { %765 = vmatpush1.bf16.msra.mxu0 %v1408_v29  ;;  %v1481_v29 = vld [vmem:[#allocation6 + $0x280] ss:$8 sps:$4 sm:$0xff]  }
  0x60   :  { %766 = vmatprep.subr.bf16.mxu0 %v1409_v30  ;;  %720 = vmatpush1.bf16.msra.mxu1 %v1480_v47  ;;  %v1489_v30 = vld [vmem:[#allocation6 + $0x294] ss:$8 sps:$4 sm:$0xff]   ;;  %v1529_v47 = vld [vmem:[#allocation3 + $0x10] ss:$24 sps:$4 sm:$0xff]  }
  0x61   :  { %721 = vmatprep.subr.bf16.mxu1 %v1484_v48  ;;  %v1542_v48 = vld [vmem:[#allocation8 + $0x68] sm:$0xff]  }
  0x63   :  { %767 = vmatpush1.bf16.msra.mxu0 %v1411_v33  ;;  %v1487_v33 = vld [vmem:[#allocation6 + $0x290] ss:$8 sps:$4 sm:$0xff]  }
  0x64   :  { %768 = vmatprep.subr.bf16.mxu0 %v1412_v34  ;;  %722 = vmatpush1.bf16.msra.mxu1 %v1486_v51  ;;  %v1495_v34 = vld [vmem:[#allocation6 + $0x2a4] ss:$8 sps:$4 sm:$0xff]   ;;  %v1545_v51 = vld [vmem:[#allocation8 + $0x30] sm:$0xff]  }
  0x65   :  { %723 = vmatprep.subr.bf16.mxu1 %v1490_v52  ;;  %v1546_v52 = vld [vmem:[#allocation8 + $0x78] sm:$0xff]  }
  0x67   :  { %769 = vmatpush1.bf16.msra.mxu0 %v1414_v37  ;;  %v1501_v37 = vld [vmem:[#allocation6 + $0x2b4] ss:$8 sps:$4 sm:$0xff]  }
  0x68   :  { %770 = vmatprep.subr.bf16.mxu0 %v1415_v38  ;;  %724 = vmatpush1.bf16.msra.mxu1 %v1492_v55  ;;  %v1499_v38 = vld [vmem:[#allocation6 + $0x2b0] ss:$8 sps:$4 sm:$0xff]   ;;  %v1709_v55 = vmov 0  }
  0x69   :  { %725 = vmatprep.subr.bf16.mxu1 %v1496_v57  ;;  %1378 = vset.pattern.permute.xlu0 %v1709_v55 }
  0x6b   :  { %771 = vmatpush1.bf16.msra.mxu0 %v1417_v41  ;;  %v1513_v41 = vld [vmem:[#allocation6 + $0x2d4] ss:$8 sps:$4 sm:$0xff]  }
  0x6c   :  { %772 = vmatprep.subr.bf16.mxu0 %v1418_v42  ;;  %726 = vmatpush1.bf16.msra.mxu1 %v1498_v60  ;;  %v1511_v42 = vld [vmem:[#allocation6 + $0x2d0] ss:$8 sps:$4 sm:$0xff]  }
  0x6d   :  { %727 = vmatprep.subr.bf16.mxu1 %v1502_v62  ;;  %v1820_v62 = vshrl.u32 %v849_v61, 7 }
  0x6f   :  { %773 = vmatpush1.bf16.msra.mxu0 %v1420_v45  ;;  %v1528_v45 = vld [vmem:[#allocation6 + $0x2f4] ss:$8 sps:$4 sm:$0xff]  }
  0x70   :  { %774 = vmatprep.subr.bf16.mxu0 %v1421_v46  ;;  %728 = vmatpush1.bf16.msra.mxu1 %v1504_v2  ;;  %v1526_v46 = vld [vmem:[#allocation6 + $0x2f0] ss:$8 sps:$4 sm:$0xff]  }
  0x71   :  { %729 = vmatprep.subr.bf16.mxu1 %v1508_v3 }
  0x73   :  { %775 = vmatpush1.bf16.msra.mxu0 %v1423_v49  ;;  %v1543_v49 = vld [vmem:[#allocation8 + $0x28] sm:$0xff]  }
  0x74   :  { %776 = vmatprep.subr.bf16.mxu0 %v1424_v50  ;;  %730 = vmatpush1.bf16.msra.mxu1 %v1510_v7  ;;  %v1544_v50 = vld [vmem:[#allocation8 + $0x70] sm:$0xff]  }
  0x75   :  { %731 = vmatprep.subr.bf16.mxu1 %v1514_v8 }
  0x77   :  { %777 = vmatpush1.bf16.msra.mxu0 %v1428_v53  ;;  %v1547_v53 = vld [vmem:[#allocation8 + $0x38] sm:$0xff]  }
  0x78   :  { %789 = vmatprep.subr.bf16.mxu0 %v1435_v54  ;;  %732 = vmatpush1.bf16.msra.mxu1 %v1516_v10  ;;  %v1050_v54 = vld [vmem:[%s1917_s8] sm:$0xff] }
  0x79   :  { %733 = vmatprep.subr.bf16.mxu1 %v1520_v12  ;;  %1055 = vperm.xlu0 %1378, %v1050_v54  }
  0x7a   :  { %779 = vmatmul.mubr.bf16.vlgmr.msra.gmra.mrb[0].mxu0 %v1430_v56  ;;  %v1051_v56 = vld [vmem:[%s1917_s8 + $0x8] sm:$0xff] }
  0x7b   :  { %790 = vmatpush1.bf16.msra.mxu0 %v1433_v58  ;;  %821 = vmatprep.mubr.bf16.mxu0 %v1531_v0  ;;  %v847_v0 = vld [vmem:[%s1911_s2] sm:$0x3] }
  0x7c   :  { %791 = vmatprep.subr.bf16.mxu0 %v1441_v59  ;;  %734 = vmatpush1.bf16.msra.mxu1 %v1522_v14 }
  0x7d   :  { %1333 = vmatprep.subr.bf16.mxu1 %v1532_v15  ;;  %1060 = vperm.xlu0 %1378, %v1051_v56  }
  0x7f   :  { %792 = vmatpush1.bf16.msra.mxu0 %v1439_v63  ;;  %736 = vmatmul.mubr.bf16.vlgmr.msra.gmra.mrb[0].mxu1 %v1523_v18  ;;  %v851_v63 = vsub.s32 0, %v1820_v62 }
  0x80   :  { %793 = vmatprep.subr.bf16.mxu0 %v1447_v1  ;;  %1334 = vmatpush3.bf16.msra.mxu1 %v1533_v19  ;;  %v855_v1 = vsub.s32 1, %v1820_v62  ;;  %v1315_v19 = vld [vmem:[%s1913_s4] ss:$0 sm:$0xff] }
  0x81   :  { %1335 = vmatprep.subr.bf16.mxu1 %v1534_v20  ;;  %v852_v2 = vrot.slane %v847_v0, %v851_v63 }
  0x83   :  { %794 = vmatpush1.bf16.msra.mxu0 %v1445_v4  ;;  %v856_v4 = vrot.slane %v847_v0, %v855_v1 }
  0x84   :  { %795 = vmatprep.subr.bf16.mxu0 %v1453_v5  ;;  %1336 = vmatpush3.bf16.msra.mxu1 %v1535_v23 }
  0x85   :  { %1337 = vmatprep.subr.bf16.mxu1 %v1536_v24 }
  0x87   :  { %796 = vmatpush1.bf16.msra.mxu0 %v1451_v6 }
  0x88   :  { %797 = vmatprep.subr.bf16.mxu0 %v1459_v9  ;;  %1338 = vmatpush3.bf16.msra.mxu1 %v1537_v27 }
  0x89   :  { %1339 = vmatprep.subr.bf16.mxu1 %v1538_v28 }
  0x8b   :  { %798 = vmatpush1.bf16.msra.mxu0 %v1457_v11 }
  0x8c   :  { %799 = vmatprep.subr.bf16.mxu0 %v1465_v13  ;;  %1340 = vmatpush3.bf16.msra.mxu1 %v1539_v31 }
  0x8d   :  { %1341 = vmatprep.subr.bf16.mxu1 %v1540_v32 }
  0x8f   :  { %800 = vmatpush1.bf16.msra.mxu0 %v1463_v16 }
  0x90   :  { %801 = vmatprep.subr.bf16.mxu0 %v1471_v17  ;;  %1342 = vmatpush3.bf16.msra.mxu1 %v1541_v35 }
  0x91   :  { %1343 = vmatprep.subr.bf16.mxu1 %v1542_v48 }
  0x93   :  { %802 = vmatpush1.bf16.msra.mxu0 %v1469_v21 }
  0x94   :  { %803 = vmatprep.subr.bf16.mxu0 %v1477_v22  ;;  %1344 = vmatpush3.bf16.msra.mxu1 %v1543_v49 }
  0x95   :  { %1345 = vmatprep.subr.bf16.mxu1 %v1544_v50 }
  0x97   :  { %804 = vmatpush1.bf16.msra.mxu0 %v1475_v25 }
  0x98   :  { %805 = vmatprep.subr.bf16.mxu0 %v1483_v26  ;;  %1346 = vmatpush3.bf16.msra.mxu1 %v1545_v51 }
  0x99   :  { %1347 = vmatprep.subr.bf16.mxu1 %v1546_v52 }
  0x9b   :  { %806 = vmatpush1.bf16.msra.mxu0 %v1481_v29 }
  0x9c   :  { %807 = vmatprep.subr.bf16.mxu0 %v1489_v30  ;;  %1348 = vmatpush3.bf16.msra.mxu1 %v1547_v53 }
  0x9f   :  { %808 = vmatpush1.bf16.msra.mxu0 %v1487_v33 }
  0xa0   :  { %809 = vmatprep.subr.bf16.mxu0 %v1495_v34 }
  0xa3   :  { %810 = vmatpush1.bf16.msra.mxu0 %v1493_v36 }
  0xa4   :  { %811 = vmatprep.subr.bf16.mxu0 %v1501_v37 }
  0xa7   :  { %812 = vmatpush1.bf16.msra.mxu0 %v1499_v38  ;;  %v1047_v38 = vld [vmem:[%s1914_s5] sm:$0xff] }
  0xa8   :  { %813 = vmatprep.subr.bf16.mxu0 %v1507_v39 }
  0xab   :  { %814 = vmatpush1.bf16.msra.mxu0 %v1505_v40 }
  0xac   :  { %815 = vmatprep.subr.bf16.mxu0 %v1513_v41  ;;  %v1049_v41 = vld [vmem:[%s1915_s6] sm:$0x1] }
  0xad   :  { %v1135_v50 = vmul.f32 0.5, %v1049_v41 }
  0xaf   :  { %816 = vmatpush1.bf16.msra.mxu0 %v1511_v42  ;;  %v1119_v42 = vsub.f32 1.0, %v1047_v38 }
  0xb0   :  { %817 = vmatprep.subr.bf16.mxu0 %v1519_v43 }
  0xb3   :  { %818 = vmatpush1.bf16.msra.mxu0 %v1517_v44  ;;  %v1048_v44 = vld [vmem:[%s1914_s5 + $0x8] sm:$0xff] }
  0xb4   :  { %819 = vmatprep.subr.bf16.mxu0 %v1528_v45  ;;  %v1120_v48 = vsub.f32 1.0, %v1048_v44 }
  0xb7   :  { %820 = vmatpush1.bf16.msra.mxu0 %v1526_v46 }
  0xba   :  { %822 = vmatmul.mubr.bf16.vlgmr.msra.gmra.mrb[0].mxu0 %v1529_v47 }
 0x152   :  { %v737_v57 = vpop.f32.mrb[0].mxu1 }
 0x153   :  { %v739_v58 = vpop.f32.mrb[1].mxu1 }
 0x154   :  { %v741_v59 = vpop.f32.mrb[2].mxu1 }
 0x155   :  { %v743_v60 = vpop.f32.mrb[3].mxu1 }
 0x18d   :  { %v823_v3 = vpop.f32.mrb[0].mxu0 }
 0x18e   :  { %v1355_v5 = vadd.f32 %v823_v3, %v737_v57  ;;  %v825_v6 = vpop.f32.mrb[1].mxu0 }
 0x18f   :  { %v1356_v7 = vadd.f32 %v825_v6, %v739_v58  ;;  %v827_v8 = vpop.f32.mrb[2].mxu0 }
 0x190   :  { %v859_v9 = vadd.f32 %v1355_v5, %v852_v2  ;;  %v1357_v10 = vadd.f32 %v827_v8, %v741_v59  ;;  %v829_v11 = vpop.f32.mrb[3].mxu0 }
 0x191   :  { %v860_v12 = vadd.f32 %v1356_v7, %v856_v4  ;;  %v1358_v13 = vadd.f32 %v829_v11, %v743_v60 }
 0x192   :  { %863 = vst [vmem:[#allocation9] sm:$0xff] %v859_v9  ;;  %v861_v14 = vadd.f32 %v1357_v10, %v852_v2  ;;  %v1142_v2 = vrot.slane %v1135_v50, %v851_v63 }
 0x193   :  { %864 = vst [vmem:[#allocation9 + $0x8] sm:$0xff] %v860_v12  ;;  %v862_v15 = vadd.f32 %v1358_v13, %v856_v4 }
 0x194   :  { %865 = vst [vmem:[#allocation9 + $0x10] sm:$0xff] %v861_v14  ;;  %v867_v16 = vpack.c.bf16 %v861_v14, %v859_v9 }
 0x195   :  { %866 = vst [vmem:[#allocation9 + $0x18] sm:$0xff] %v862_v15  ;;  %v868_v17 = vpack.c.bf16 %v862_v15, %v860_v12 }
 0x197   :  { %1036 = vmatprep.mubr.bf16.mxu1 %v868_v17 }
 0x198   :  { %1037 = vmatmul.mubr.bf16.vlgmr.msra.gmra.mrb[4].mxu1 %v867_v16 }
 0x26b   :  { %v1349_v18 = vpop.f32.mrb[4].mxu1 }
 0x26c   :  { %v1350_v20 = vpop.f32.mrb[5].mxu1 }
 0x26d   :  { %v1351_v21 = vadd.f32 %v1350_v20, %v1349_v18  ;;  %v1352_v22 = vpop.f32.mrb[6].mxu1 }
 0x26e   :  { %v1353_v23 = vpop.f32.mrb[7].mxu1 }
 0x26f   :  { %v1832_v24 = vadd.f32 %v1351_v21, %v1315_v19  ;;  %v1354_v25 = vadd.f32 %v1353_v23, %v1352_v22  ;;  %v1056_v23 = vpop.permute.xlu0 %1055 }
 0x271   :  { %v1071_v26 = vand.u32 2147483647, %v1832_v24  ;;  %1045 = vst [vmem:[#allocation10] sm:$0xff] %v1832_v24  ;;  %v1836_v27 = vadd.f32 %v1354_v25, %v1315_v19  ;;  %vm1111_vm0 = vcmp.ge.f32.partialorder %v1832_v24, 0.0  ;;  %v1079_v5 = vmax.f32 %v1832_v24, 0.0 }
 0x272   :  { %v1081_v9 = vmul.f32 %v1047_v38, %v1832_v24  ;;  %v1332_v19 = vld [vmem:[%s1916_s7] ss:$0 sm:$0xff]  ;;  %s1710_s7 = smov [#allocation10]  }
 0x273   :  { %v1073_v28 = vsub.f32 0.0, %v1071_v26  ;;  %v1072_v29 = vand.u32 2147483647, %v1836_v27  ;;  %1046 = vst [vmem:[#allocation10 + $0x8] sm:$0xff] %v1836_v27  ;;  %vm1112_vm1 = vcmp.ge.f32.partialorder %v1836_v27, 0.0  ;;  %v1080_v62 = vmax.f32 %v1836_v27, 0.0  ;;  %v1061_v41 = vpop.permute.xlu0 %1060 }
 0x274   :  { %v1082_v63 = vmul.f32 %v1048_v44, %v1836_v27  ;;  %v1083_v24 = vsub.f32 %v1079_v5, %v1081_v9  ;;  %s1181_s14 = sshll.u32 %s1710_s7, 4  ;;  %s1182_s14 = int_to_ptr.vmem [resolvable:$true] %s1181_s14 }
 0x275   :  { %v1075_v30 = vmul.f32 1.442695, %v1073_v28  ;;  %v1074_v31 = vsub.f32 0.0, %v1072_v29  ;;  %s1626_s17 = scalar_lea.vmem %s1182_s14, 256  ;;  %p1631_p11 = scmp.lt.s32.totalorder %s1182_s14, %s1182_s14 }
 0x276   :  { %v1084_v27 = vsub.f32 %v1080_v62, %v1082_v63  ;;  %p1627_p10 = scmp.ne.s32.totalorder %s1182_s14, %s1626_s17  ;;  %p1632_p12 = scmp.lt.s32.totalorder %s1626_s17, %s1626_s17 }
 0x277   :  { %1548 = vpow2.f32 %v1075_v30  ;;  %v1077_v32 = vmul.f32 1.442695, %v1074_v31  ;;  %v1069_v31 = vmul.f32 %v1332_v19, %v1056_v23 }
 0x278   :  { %p1633_p13 = por %p1632_p12, %p1631_p11 }
 0x279   :  { %1550 = vpow2.f32 %v1077_v32 }
 0x27a   :  { %p1634_p0 = pnand %p1633_p13, %p1627_p10 }
 0x281   :  { %v1549_v33 = vpop.eup %1548 }
 0x282   :  { %v1085_v34 = vadd.f32 1.0, %v1549_v33  ;;  %v1088_v49 = vmul.f32 -0.5, %v1549_v33  ;;  %v1091_v6 = vand.u32 2147483647, %v1549_v33 }
 0x283   :  { %v1840_v35 = vpop.eup %1550 }
 0x284   :  { %v1094_v36 = vadd.f32 1.0, %v1840_v35  ;;  %1552 = vrcp.f32 %v1085_v34  ;;  %v1097_v56 = vmul.f32 -0.5, %v1840_v35  ;;  %v1089_v1 = vadd.f32 1.0, %v1088_v49 }
 0x285   :  { %v1100_v15 = vand.u32 2147483647, %v1840_v35  ;;  %vm1092_vm2 = vcmp.lt.f32.partialorder %v1091_v6, 0.0004427343 }
 0x286   :  { %1554 = vrcp.f32 %v1094_v36  ;;  %v1098_v11 = vadd.f32 1.0, %v1097_v56  ;;  %v1090_v17 = vmul.f32 %v1549_v33, %v1089_v1 }
 0x287   :  { %1556 = vlog2.f32 %v1085_v34  ;;  %vm1101_vm3 = vcmp.lt.f32.partialorder %v1100_v15, 0.0004427343 }
 0x288   :  { %1558 = vlog2.f32 %v1094_v36  ;;  %v1099_v26 = vmul.f32 %v1840_v35, %v1098_v11 }
 0x28e   :  { %v1553_v37 = vpop.eup %1552 }
 0x28f   :  { %v1113_v39 = vmul.f32 %v1553_v37, %v1549_v33 }
 0x290   :  { %v1555_v40 = vpop.eup %1554 }
 0x291   :  { %v1115_v43 = vsel %vm1111_vm0, %v1553_v37, %v1113_v39  ;;  %v1114_v45 = vmul.f32 %v1555_v40, %v1840_v35  ;;  %v1557_v58 = vpop.eup %1556 }
 0x292   :  { %v1121_v46 = vsub.f32 1.0, %v1115_v43  ;;  %v1131_v47 = vmul.f32 %v1115_v43, %v1115_v43  ;;  %v1117_v52 = vmul.f32 %v1115_v43, %v1047_v38  ;;  %v1559_v4 = vpop.eup %1558  ;;  %v1087_v10 = vmul.f32 0.6931472, %v1557_v58 }
 0x293   :  { %v1116_v51 = vsel %vm1112_vm1, %v1555_v40, %v1114_v45  ;;  %v1096_v18 = vmul.f32 0.6931472, %v1559_v4 }
 0x294   :  { %v1123_v53 = vmul.f32 %v1121_v46, %v1119_v42  ;;  %v1133_v54 = vmul.f32 %v1131_v47, %v1131_v47  ;;  %v1122_v55 = vsub.f32 1.0, %v1116_v51  ;;  %v1132_v57 = vmul.f32 %v1116_v51, %v1116_v51 }
 0x295   :  { %v1118_v61 = vmul.f32 %v1116_v51, %v1048_v44  ;;  %v1093_v25 = vsel %vm1092_vm2, %v1090_v17, %v1087_v10  ;;  %v1102_v32 = vsel %vm1101_vm3, %v1099_v26, %v1096_v18 }
 0x296   :  { %v1125_v59 = vadd.f32 %v1123_v53, %v1117_v52  ;;  %v1146_v60 = vmul.f32 %v1133_v54, %v1119_v42  ;;  %v1124_v0 = vmul.f32 %v1122_v55, %v1120_v48  ;;  %v1134_v3 = vmul.f32 %v1132_v57, %v1132_v57 }
 0x297   :  { %v1103_v33 = vadd.f32 %v1093_v25, %v1083_v24  ;;  %v1104_v39 = vadd.f32 %v1102_v32, %v1084_v27 }
 0x298   :  { %v1127_v7 = vsub.f32 1.0, %v1125_v59  ;;  %v1126_v8 = vadd.f32 %v1124_v0, %v1118_v61  ;;  %v1147_v12 = vmul.f32 %v1134_v3, %v1120_v48  ;;  %v1148_v14 = vadd.f32 %v1146_v60, %v1047_v38 }
 0x29a   :  { %v1129_v13 = vmul.f32 %v1127_v7, %v1127_v7  ;;  %v1128_v16 = vsub.f32 1.0, %v1126_v8  ;;  %v1149_v22 = vadd.f32 %v1147_v12, %v1048_v44  ;;  %v1150_v29 = vmul.f32 0.25, %v1148_v14 }
 0x29b   :  { %v1070_v44 = vmul.f32 %v1332_v19, %v1061_v41 }
 0x29c   :  { %v1136_v20 = vmul.f32 0.25, %v1129_v13  ;;  %v1130_v21 = vmul.f32 %v1128_v16, %v1128_v16  ;;  %v1151_v37 = vmul.f32 0.25, %v1149_v22 }
 0x29e   :  { %v1144_v28 = vadd.f32 %v1142_v2, %v1136_v20  ;;  %v1137_v30 = vmul.f32 0.25, %v1130_v21 }
 0x2a0   :  { %v1152_v34 = vadd.f32 %v1150_v29, %v1144_v28  ;;  %v1145_v36 = vadd.f32 %v1142_v2, %v1137_v30 }
 0x2a2   :  { %v1154_v38 = vmul.f32 %v1152_v34, %v1103_v33  ;;  %v1153_v40 = vadd.f32 %v1151_v37, %v1145_v36 }
 0x2a4   :  { %v1156_v42 = vmul.f32 %v1154_v38, %v1069_v31  ;;  %v1155_v43 = vmul.f32 %v1153_v40, %v1104_v39 }
 0x2a6   :  { %1158 = vadd.xlane.f32.xlu1 %v1156_v42  ;;  %v1157_v35 = vmul.f32 %v1155_v43, %v1070_v44 }
 0x2aa   :  { %1160 = vadd.xlane.f32.xlu1 %v1157_v35 }
 0x2ab   :  { %1637 = shalt.err (!%p1634_p0)
}
 0x2ac   :  { %s1638_s13 = scalar_lea.hbm %s1919_s10, 256 }
 0x2ad   :  { %p1639_p1 = scmp.ne.s32.totalorder %s1919_s10, %s1638_s13  ;;  %p1642_p2 = scmp.lt.u32.totalorder %s1638_s13, %s1919_s10 }
 0x2af   :  { %p1644_p3 = pnand %p1642_p2, %p1639_p1 }
 0x2b1   :  { %1647 = shalt.err (!%p1644_p3)
}
 0x2b2   :  { %1187 = dma.vmem_to_hbm [thread:$0]  %s1182_s14, 256, %s1919_s10, [#allocation11], %s1701_s27, %s1701_s27, %s1702_s28  }
 0x2b3   :  { %s1648_s23 = scalar_lea.vmem %s1170_s16, 512  ;;  %p1653_p5 = scmp.lt.s32.totalorder %s1170_s16, %s1170_s16 }
 0x2b4   :  { %p1649_p4 = scmp.ne.s32.totalorder %s1170_s16, %s1648_s23  ;;  %p1654_p6 = scmp.lt.s32.totalorder %s1648_s23, %s1648_s23 }
 0x2b6   :  { %p1655_p7 = por %p1654_p6, %p1653_p5 }
 0x2b8   :  { %p1656_p8 = pnand %p1655_p7, %p1649_p4 }
 0x2ba   :  { %1659 = shalt.err (!%p1656_p8)
}
 0x2bb   :  { %s1660_s8 = scalar_lea.hbm %s1918_s9, 512 }
 0x2bc   :  { %p1661_p9 = scmp.ne.s32.totalorder %s1918_s9, %s1660_s8  ;;  %p1664_p10 = scmp.lt.u32.totalorder %s1660_s8, %s1918_s9 }
 0x2be   :  { %p1666_p11 = pnand %p1664_p10, %p1661_p9 }
 0x2c0   :  { %1669 = shalt.err (!%p1666_p11)
}
 0x2c1   :  { %s1712_s10 = smov 256   ;;  %s1713_s30 = smov 16  }
 0x2c2   :  { %1175 = dma.vmem_to_hbm [thread:$0]  %s1170_s16, 512, %s1918_s9, [#allocation5], %s1712_s10, %s1712_s10, %s1713_s30  }
 0x2c3   :  { %s1714_s6 = smov [#allocation12]  }
 0x2c4   :  { %s1193_s7 = sshll.u32 %s1714_s6, 4  ;;  %s1194_s7 = int_to_ptr.vmem [resolvable:$true] %s1193_s7 }
 0x2c5   :  { %s1670_s14 = scalar_lea.vmem %s1194_s7, 256  ;;  %p1675_p13 = scmp.lt.s32.totalorder %s1194_s7, %s1194_s7 }
 0x2c6   :  { %p1671_p12 = scmp.ne.s32.totalorder %s1194_s7, %s1670_s14  ;;  %p1676_p0 = scmp.lt.s32.totalorder %s1670_s14, %s1670_s14 }
 0x2c8   :  { %p1677_p1 = por %p1676_p0, %p1675_p13 }
 0x2ca   :  { %p1678_p2 = pnand %p1677_p1, %p1671_p12 }
 0x333   :  { %v1159_v45 = vpop.xlane.xlu1 %1158 }
 0x334   :  { %1162 = vst [vmem:[#allocation12] sm:$0xff] %v1159_v45 }
 0x337   :  { %v1161_v46 = vpop.xlane.xlu1 %1160 }
 0x338   :  { %1163 = vst [vmem:[#allocation12 + $0x8] sm:$0xff] %v1161_v46 }
 0x339   :  { %1681 = shalt.err (!%p1678_p2)
}
 0x33a   :  { %s1682_s19 = scalar_lea.hbm %s1920_s11, 256 }
 0x33b   :  { %p1683_p3 = scmp.ne.s32.totalorder %s1920_s11, %s1682_s19  ;;  %p1686_p4 = scmp.lt.u32.totalorder %s1682_s19, %s1920_s11 }
 0x33d   :  { %p1688_p5 = pnand %p1686_p4, %p1683_p3 }
 0x33f   :  { %1691 = shalt.err (!%p1688_p5)
}
 0x340   :  { %1199 = dma.vmem_to_hbm [thread:$0]  %s1194_s7, 256, %s1920_s11, [#allocation11], %s1701_s27, %s1701_s27, %s1702_s28  }
 0x341   :  { %1696 = dma.done.wait [#allocation5], 512  }
 0x342   :  { %1697 = vsyncadd [#allocation5], 4294966784 }
 0x343   :  { %1698 = dma.done.wait [#allocation11], 512  }
 0x344   :  { %1699 = vsyncadd [#allocation11], 4294966784 }
 0x345   :  { %1209 = vsyncpa [#allocation4], 1 }
 0x346   :  { %1210 = vsyncpa [#allocation7], 1 }
 0x347   :  { %1211 = vsyncpa [#allocation5], 1 }
 0x348   :  { %1212 = vsyncpa [#allocation11], 1 }

</bundles_post_ra>
